<compile_context>
chip_gen: v7x
topology: tpu7x:2x2x1
jax: 0.10.0
libtpu: 0.0.40
codegen_flags: <defaults>
</compile_context>

<pallas_src>
import jax
import jax.numpy as jnp
from jax.experimental import pallas as pl
from jax.experimental.pallas import tpu as pltpu


def domain_classifier_kernel(feat_ref, sm_ref, r_ref,
                             w1_ref, b1_ref, w2_ref, b2_ref, w3_ref, b3_ref,
                             out_ref, bottl_acc):
    j = pl.program_id(0)

    @pl.when(j == 0)
    def _init():
        bottl_acc[...] = jnp.zeros_like(bottl_acc)

    # Select softmax column j without a dynamic lane slice: mask + lane reduce (tiny).
    sm = sm_ref[...]                                                  # (B, C) f32
    col = jax.lax.broadcasted_iota(jnp.int32, sm.shape, 1)
    scale = jnp.sum(jnp.where(col == j, sm, 0.0), axis=1, keepdims=True)  # (B, 1)

    # Per-class random projection: lane-dense (B, F) @ (F, BN) bf16 MXU matmul,
    # accumulated in f32.
    p = jnp.dot(feat_ref[...], r_ref[...], preferred_element_type=jnp.float32)
    bottl_acc[...] += scale * p

    @pl.when(j == pl.num_programs(0) - 1)
    def _finalize():
        # GRL(x, lambda) is the identity in the forward pass.
        bottl = bottl_acc[...]
        h = jnp.dot(bottl, w1_ref[...], preferred_element_type=jnp.float32) + b1_ref[...]
        h = jnp.maximum(h, 0.0)
        # TODO(synk): nn.Dropout(0.5) treated as eval-mode identity (no RNG mask applied).
        h = jnp.dot(h, w2_ref[...], preferred_element_type=jnp.float32) + b2_ref[...]
        h = jnp.maximum(h, 0.0)
        # Final (H -> 1) layer as a VPU reduction against a (1, H) weight row.
        out = jnp.sum(h * w3_ref[...], axis=-1, keepdims=True) + b3_ref[...]
        out_ref[...] = out.astype(out_ref.dtype)


def domain_classifier_forward(feature, softmax_output, grl_lambda, params):
    # grl_lambda only matters for the backward pass; forward is identity.
    del grl_lambda
    R, (w1, b1), (w2, b2), (w3, b3) = params
    B, F = feature.shape
    C = softmax_output.shape[1]
    BN = R.shape[1]
    H = w1.shape[1]

    # Pure row-major view of the torch (F*C, BN) layout: R2[i, j*BN + k] == R[i*C+j, k].
    R2 = R.reshape(F, C * BN)
    # bf16 feature stream (R itself is stored in bf16 at param-prep time, not per call).
    feat_bf = feature.astype(jnp.bfloat16)
    w3_row = w3.reshape(1, H)            # contiguous reshape of (H, 1) == w3.T

    grid_spec = pltpu.PrefetchScalarGridSpec(
        num_scalar_prefetch=0,
        grid=(C,),                                         # reduction over classes
        in_specs=[
            pl.BlockSpec((B, F), lambda j: (0, 0)),        # feature   (VMEM resident)
            pl.BlockSpec((B, C), lambda j: (0, 0)),        # softmax   (VMEM resident)
            pl.BlockSpec((F, BN), lambda j: (0, j)),       # per-class slab of R2 (streamed)
            pl.BlockSpec((BN, H), lambda j: (0, 0)),       # w1 (resident)
            pl.BlockSpec((1, H), lambda j: (0, 0)),        # b1
            pl.BlockSpec((H, H), lambda j: (0, 0)),        # w2 (resident)
            pl.BlockSpec((1, H), lambda j: (0, 0)),        # b2
            pl.BlockSpec((1, H), lambda j: (0, 0)),        # w3 as a row
            pl.BlockSpec((1, 1), lambda j: (0, 0)),        # b3
        ],
        out_specs=pl.BlockSpec((B, 1), lambda j: (0, 0)),
        scratch_shapes=[pltpu.VMEM((B, BN), jnp.float32)],  # bottleneck accumulator
    )

    out = pl.pallas_call(
        domain_classifier_kernel,
        out_shape=jax.ShapeDtypeStruct((B, 1), jnp.float32),
        grid_spec=grid_spec,
        compiler_params=pltpu.CompilerParams(
            # Single grid axis is a K-style reduction over classes -> "arbitrary".
            dimension_semantics=("arbitrary",),
        ),
    )(feat_bf, softmax_output, R2, w1, b1, w2, b2, w3_row, b3)
    return jnp.squeeze(out)   # matches torch output.squeeze()


if __name__ == "__main__":
    # Small shapes consistent with the module's forward:
    #   F plays the role of 2048, C = num_classes, BN = bottleneck, H = cls_fc width.
    B, F, C = 8, 128, 8
    BN, H = 256, 256

    key = jax.random.PRNGKey(0)
    ks = jax.random.split(key, 9)
    feature = jax.random.normal(ks[0], (B, F), jnp.float32)
    softmax_output = jax.nn.softmax(jax.random.normal(ks[1], (B, C), jnp.float32), axis=-1)

    # random_matrix ~ randn(F*C, BN) / sqrt(F*C); stored bf16 (param prep, done once).
    R_f32 = jax.random.normal(ks[2], (F * C, BN), jnp.float32) / jnp.sqrt(float(F * C))
    R = R_f32.astype(jnp.bfloat16)
    w1 = jax.random.normal(ks[3], (BN, H), jnp.float32) * 0.02
    b1 = jax.random.normal(ks[4], (1, H), jnp.float32) * 0.01
    w2 = jax.random.normal(ks[5], (H, H), jnp.float32) * 0.02
    b2 = jax.random.normal(ks[6], (1, H), jnp.float32) * 0.01
    w3 = jax.random.normal(ks[7], (H, 1), jnp.float32) * 0.02
    b3 = jax.random.normal(ks[8], (1, 1), jnp.float32) * 0.01
    params = (R, (w1, b1), (w2, b2), (w3, b3))

    out = domain_classifier_forward(feature, softmax_output, 1.0, params)
    out = jax.block_until_ready(out)

    # Pure-JAX reference: same math as the torch forward (eval-mode dropout), using
    # the same bf16-rounded R / feature so the comparison is apples-to-apples.
    fb = feature.astype(jnp.bfloat16).astype(jnp.float32)
    Rb = R.astype(jnp.float32)
    fm = (fb[:, :, None] * softmax_output[:, None, :]).reshape(B, F * C)
    ref = fm @ Rb
    ref = jnp.maximum(ref @ w1 + b1, 0.0)
    ref = jnp.maximum(ref @ w2 + b2, 0.0)
    ref = jnp.squeeze(ref @ w3 + b3)

    assert out.shape == (B,)
    assert jnp.allclose(out, ref, atol=1e-3, rtol=1e-3), (out, ref)
    print("KERNEL_OK")
</pallas_src>

<mosaic_0001>
module attributes {stable_mosaic.version = 11 : i64} {
  func.func @domain_classifier_kernel(%arg0: i32, %arg1: memref<8x128xbf16, #tpu.memory_space<vmem>>, %arg2: memref<8x8xf32, #tpu.memory_space<vmem>>, %arg3: memref<128x256xbf16, #tpu.memory_space<vmem>>, %arg4: memref<256x256xf32, #tpu.memory_space<vmem>>, %arg5: memref<1x256xf32, #tpu.memory_space<vmem>>, %arg6: memref<256x256xf32, #tpu.memory_space<vmem>>, %arg7: memref<1x256xf32, #tpu.memory_space<vmem>>, %arg8: memref<1x256xf32, #tpu.memory_space<vmem>>, %arg9: memref<1x1xf32, #tpu.memory_space<vmem>>, %arg10: memref<8x1xf32, #tpu.memory_space<vmem>>, %arg11: memref<8x256xf32, #tpu.memory_space<vmem>>) attributes {dimension_semantics = [#tpu.dimension_semantics<arbitrary>], iteration_bounds = array<i64: 8>, scalar_prefetch = 0 : i64, scratch_operands = 1 : i64, tpu.core_type = #tpu.core_type<tc>, window_params = [{pipeline_mode = #tpu.pipeline_mode<synchronous>, transform_indices = @transform_0, window_bounds = array<i64: 8, 128>}, {pipeline_mode = #tpu.pipeline_mode<synchronous>, transform_indices = @transform_1, window_bounds = array<i64: 8, 8>}, {transform_indices = @transform_2, window_bounds = array<i64: 128, 256>}, {pipeline_mode = #tpu.pipeline_mode<synchronous>, transform_indices = @transform_3, window_bounds = array<i64: 256, 256>}, {pipeline_mode = #tpu.pipeline_mode<synchronous>, transform_indices = @transform_4, window_bounds = array<i64: 1, 256>}, {pipeline_mode = #tpu.pipeline_mode<synchronous>, transform_indices = @transform_5, window_bounds = array<i64: 256, 256>}, {pipeline_mode = #tpu.pipeline_mode<synchronous>, transform_indices = @transform_6, window_bounds = array<i64: 1, 256>}, {pipeline_mode = #tpu.pipeline_mode<synchronous>, transform_indices = @transform_7, window_bounds = array<i64: 1, 256>}, {pipeline_mode = #tpu.pipeline_mode<synchronous>, transform_indices = @transform_8, window_bounds = array<i64: 1, 1>}, {pipeline_mode = #tpu.pipeline_mode<synchronous>, transform_indices = @transform_9, window_bounds = array<i64: 8, 1>}]} {
    %c0_i32 = arith.constant 0 : i32
    %0 = arith.cmpi eq, %arg0, %c0_i32 : i32
    %1 = arith.extui %0 : i1 to i32
    %c0_i32_0 = arith.constant 0 : i32
    %2 = arith.cmpi ne, %1, %c0_i32_0 : i32
    scf.if %2 {
      %cst_13 = arith.constant 0.000000e+00 : f32
      %22 = vector.broadcast %cst_13 : f32 to vector<8x256xf32>
      %c0_14 = arith.constant 0 : index
      %c0_15 = arith.constant 0 : index
      %23 = vector.load %arg11[%c0_14, %c0_15] : memref<8x256xf32, #tpu.memory_space<vmem>>, vector<8x256xf32>
      tpu.vector_store %arg11[%c0_14, %c0_15], %22 {strides = array<i32>} : memref<8x256xf32, #tpu.memory_space<vmem>>, vector<8x256xf32>,
    } else {
    }
    %c0 = arith.constant 0 : index
    %c0_1 = arith.constant 0 : index
    %3 = vector.load %arg2[%c0, %c0_1] : memref<8x8xf32, #tpu.memory_space<vmem>>, vector<8x8xf32>
    %4 = tpu.iota {dimensions = array<i32: 1>} : vector<8x8xi32>
    %5 = vector.broadcast %arg0 : i32 to vector<8x8xi32>
    %6 = arith.cmpi eq, %4, %5 : vector<8x8xi32>
    %cst = arith.constant 0.000000e+00 : f32
    %7 = vector.broadcast %cst : f32 to vector<8x8xf32>
    %8 = arith.select %6, %3, %7 : vector<8x8xi1>, vector<8x8xf32>
    %cst_2 = arith.constant dense<0.000000e+00> : vector<8xf32>
    %9 = vector.multi_reduction <add>, %8, %cst_2 [1] : vector<8x8xf32> to vector<8xf32>
    %10 = vector.shape_cast %9 : vector<8xf32> to vector<8x1xf32>
    %c0_3 = arith.constant 0 : index
    %c0_4 = arith.constant 0 : index
    %11 = vector.load %arg1[%c0_3, %c0_4] : memref<8x128xbf16, #tpu.memory_space<vmem>>, vector<8x128xbf16>
    %c0_5 = arith.constant 0 : index
    %c0_6 = arith.constant 0 : index
    %12 = vector.load %arg3[%c0_5, %c0_6] : memref<128x256xbf16, #tpu.memory_space<vmem>>, vector<128x256xbf16>
    %cst_7 = arith.constant dense<0.000000e+00> : vector<8x256xf32>
    %13 = tpu.matmul %11, %12, %cst_7 {dimension_numbers = #tpu.dot_dimension_numbers<[1], [0], [0], [1], [0, 0, 1, 1], [], []>} : vector<8x128xbf16>, vector<128x256xbf16>, vector<8x256xf32> -> vector<8x256xf32>
    %c0_8 = arith.constant 0 : index
    %c0_9 = arith.constant 0 : index
    %14 = vector.load %arg11[%c0_8, %c0_9] : memref<8x256xf32, #tpu.memory_space<vmem>>, vector<8x256xf32>
    %15 = vector.broadcast %10 : vector<8x1xf32> to vector<8x256xf32>
    %16 = arith.mulf %15, %13 : vector<8x256xf32>
    %17 = arith.addf %14, %16 : vector<8x256xf32>
    %c0_10 = arith.constant 0 : index
    %c0_11 = arith.constant 0 : index
    %18 = vector.load %arg11[%c0_10, %c0_11] : memref<8x256xf32, #tpu.memory_space<vmem>>, vector<8x256xf32>
    tpu.vector_store %arg11[%c0_10, %c0_11], %17 {strides = array<i32>} : memref<8x256xf32, #tpu.memory_space<vmem>>, vector<8x256xf32>,
    %c7_i32 = arith.constant 7 : i32
    %19 = arith.cmpi eq, %arg0, %c7_i32 : i32
    %20 = arith.extui %19 : i1 to i32
    %c0_i32_12 = arith.constant 0 : i32
    %21 = arith.cmpi ne, %20, %c0_i32_12 : i32
    scf.if %21 {
      %c0_13 = arith.constant 0 : index
      %c0_14 = arith.constant 0 : index
      %22 = vector.load %arg11[%c0_13, %c0_14] : memref<8x256xf32, #tpu.memory_space<vmem>>, vector<8x256xf32>
      %c0_15 = arith.constant 0 : index
      %c0_16 = arith.constant 0 : index
      %23 = vector.load %arg4[%c0_15, %c0_16] : memref<256x256xf32, #tpu.memory_space<vmem>>, vector<256x256xf32>
      %cst_17 = arith.constant dense<0.000000e+00> : vector<8x256xf32>
      %24 = tpu.matmul %22, %23, %cst_17 {dimension_numbers = #tpu.dot_dimension_numbers<[1], [0], [0], [1], [0, 0, 1, 1], [], []>} : vector<8x256xf32>, vector<256x256xf32>, vector<8x256xf32> -> vector<8x256xf32>
      %c0_18 = arith.constant 0 : index
      %c0_19 = arith.constant 0 : index
      %25 = vector.load %arg5[%c0_18, %c0_19] : memref<1x256xf32, #tpu.memory_space<vmem>>, vector<1x256xf32>
      %26 = vector.broadcast %25 : vector<1x256xf32> to vector<8x256xf32>
      %27 = arith.addf %24, %26 : vector<8x256xf32>
      %cst_20 = arith.constant 0.000000e+00 : f32
      %28 = vector.broadcast %cst_20 : f32 to vector<8x256xf32>
      %29 = arith.maximumf %27, %28 : vector<8x256xf32>
      %c0_21 = arith.constant 0 : index
      %c0_22 = arith.constant 0 : index
      %30 = vector.load %arg6[%c0_21, %c0_22] : memref<256x256xf32, #tpu.memory_space<vmem>>, vector<256x256xf32>
      %cst_23 = arith.constant dense<0.000000e+00> : vector<8x256xf32>
      %31 = tpu.matmul %29, %30, %cst_23 {dimension_numbers = #tpu.dot_dimension_numbers<[1], [0], [0], [1], [0, 0, 1, 1], [], []>} : vector<8x256xf32>, vector<256x256xf32>, vector<8x256xf32> -> vector<8x256xf32>
      %c0_24 = arith.constant 0 : index
      %c0_25 = arith.constant 0 : index
      %32 = vector.load %arg7[%c0_24, %c0_25] : memref<1x256xf32, #tpu.memory_space<vmem>>, vector<1x256xf32>
      %33 = vector.broadcast %32 : vector<1x256xf32> to vector<8x256xf32>
      %34 = arith.addf %31, %33 : vector<8x256xf32>
      %cst_26 = arith.constant 0.000000e+00 : f32
      %35 = vector.broadcast %cst_26 : f32 to vector<8x256xf32>
      %36 = arith.maximumf %34, %35 : vector<8x256xf32>
      %c0_27 = arith.constant 0 : index
      %c0_28 = arith.constant 0 : index
      %37 = vector.load %arg8[%c0_27, %c0_28] : memref<1x256xf32, #tpu.memory_space<vmem>>, vector<1x256xf32>
      %38 = vector.broadcast %37 : vector<1x256xf32> to vector<8x256xf32>
      %39 = arith.mulf %36, %38 : vector<8x256xf32>
      %cst_29 = arith.constant dense<0.000000e+00> : vector<8xf32>
      %40 = vector.multi_reduction <add>, %39, %cst_29 [1] : vector<8x256xf32> to vector<8xf32>
      %41 = vector.shape_cast %40 : vector<8xf32> to vector<8x1xf32>
      %c0_30 = arith.constant 0 : index
      %c0_31 = arith.constant 0 : index
      %42 = vector.load %arg9[%c0_30, %c0_31] : memref<1x1xf32, #tpu.memory_space<vmem>>, vector<1x1xf32>
      %43 = vector.broadcast %42 : vector<1x1xf32> to vector<8x1xf32>
      %44 = arith.addf %41, %43 : vector<8x1xf32>
      %c0_32 = arith.constant 0 : index
      %c0_33 = arith.constant 0 : index
      %45 = vector.load %arg10[%c0_32, %c0_33] : memref<8x1xf32, #tpu.memory_space<vmem>>, vector<8x1xf32>
      tpu.vector_store %arg10[%c0_32, %c0_33], %44 {strides = array<i32>} : memref<8x1xf32, #tpu.memory_space<vmem>>, vector<8x1xf32>,
    } else {
    }
    return
  }
  func.func @transform_0(%arg0: i32) -> (i32, i32) {
    %c0_i32 = arith.constant 0 : i32
    %c0_i32_0 = arith.constant 0 : i32
    %c0_i32_1 = arith.constant 0 : i32
    return %c0_i32, %c0_i32_0 : i32, i32
  }
  func.func @transform_1(%arg0: i32) -> (i32, i32) {
    %c0_i32 = arith.constant 0 : i32
    %c0_i32_0 = arith.constant 0 : i32
    %c0_i32_1 = arith.constant 0 : i32
    return %c0_i32, %c0_i32_0 : i32, i32
  }
  func.func @transform_2(%arg0: i32) -> (i32, i32) {
    %c0_i32 = arith.constant 0 : i32
    %c0_i32_0 = arith.constant 0 : i32
    return %c0_i32, %arg0 : i32, i32
  }
  func.func @transform_3(%arg0: i32) -> (i32, i32) {
    %c0_i32 = arith.constant 0 : i32
    %c0_i32_0 = arith.constant 0 : i32
    %c0_i32_1 = arith.constant 0 : i32
    return %c0_i32, %c0_i32_0 : i32, i32
  }
  func.func @transform_4(%arg0: i32) -> (i32, i32) {
    %c0_i32 = arith.constant 0 : i32
    %c0_i32_0 = arith.constant 0 : i32
    %c0_i32_1 = arith.constant 0 : i32
    return %c0_i32, %c0_i32_0 : i32, i32
  }
  func.func @transform_5(%arg0: i32) -> (i32, i32) {
    %c0_i32 = arith.constant 0 : i32
    %c0_i32_0 = arith.constant 0 : i32
    %c0_i32_1 = arith.constant 0 : i32
    return %c0_i32, %c0_i32_0 : i32, i32
  }
  func.func @transform_6(%arg0: i32) -> (i32, i32) {
    %c0_i32 = arith.constant 0 : i32
    %c0_i32_0 = arith.constant 0 : i32
    %c0_i32_1 = arith.constant 0 : i32
    return %c0_i32, %c0_i32_0 : i32, i32
  }
  func.func @transform_7(%arg0: i32) -> (i32, i32) {
    %c0_i32 = arith.constant 0 : i32
    %c0_i32_0 = arith.constant 0 : i32
    %c0_i32_1 = arith.constant 0 : i32
    return %c0_i32, %c0_i32_0 : i32, i32
  }
  func.func @transform_8(%arg0: i32) -> (i32, i32) {
    %c0_i32 = arith.constant 0 : i32
    %c0_i32_0 = arith.constant 0 : i32
    %c0_i32_1 = arith.constant 0 : i32
    return %c0_i32, %c0_i32_0 : i32, i32
  }
  func.func @transform_9(%arg0: i32) -> (i32, i32) {
    %c0_i32 = arith.constant 0 : i32
    %c0_i32_0 = arith.constant 0 : i32
    %c0_i32_1 = arith.constant 0 : i32
    return %c0_i32, %c0_i32_0 : i32, i32
  }
}

</mosaic_0001>

<bundles_post_ra>
// kernel: tpu_custom_call.1
= control target key start
LH: loop header
LB: loop body
LE: loop exit
PB: predicated region body
PF: predicated region fallthrough
CT: control target
= control target key end

     0   :  { %s1763_s0 = inlined_call_operand.hbm [shape: bf16[8,128], index: 0, kind: input, shape index: {}]   ;;  %s1764_s1 = inlined_call_operand.hbm [shape: f32[8,8], index: 1, kind: input, shape index: {}]   ;;  %s1765_s2 = inlined_call_operand.hbm [shape: bf16[128,2048], index: 2, kind: input, shape index: {}]   ;;  %s1766_s3 = inlined_call_operand.hbm [shape: f32[256,256], index: 3, kind: input, shape index: {}]   ;;  %s1767_s4 = inlined_call_operand.vmem [shape: f32[1,256], index: 4, kind: input, shape index: {}]   ;;  %s1768_s5 = inlined_call_operand.hbm [shape: f32[256,256], index: 5, kind: input, shape index: {}]   ;;  %s1769_s6 = inlined_call_operand.vmem [shape: f32[1,256], index: 6, kind: input, shape index: {}]   ;;  %s1770_s7 = inlined_call_operand.vmem [shape: f32[1,256], index: 7, kind: input, shape index: {}]   ;;  %s1771_s8 = inlined_call_operand.<no memory space> [shape: f32[1,1], index: 8, kind: input, shape index: {}]   ;;  %s1772_s9 = inlined_call_operand.vmem [shape: f32[8,1], index: 9, kind: output, shape index: {}]  }
   0x1   :  { %1779 = sst [smem:[#allocation19_spill]] %s1763_s0  ;;  %v14_v0 = vstv %s1771_s8 }
   0x2   :  { %1780 = sst [smem:[#allocation20_spill]] %s1764_s1  ;;  %15 = vst [vmem:[#allocation3] sm:$0x1] %v14_v0 }
   0x3   :  { %16 = vsyncpa [#allocation5], 0 }
   0x4   :  { %17 = vsyncpa [#allocation7], 0 }
   0x5   :  { %18 = vsyncpa [#allocation11], 0  ;;  %s1500_s11 = smov 0   ;;  %s1502_s12 = smov 0  }
   0x6   :  { %s1504_s13 = smov 0   ;;  %s1506_s14 = smov 0  }
   0x7 LB: > { %s1519_s8 = sadd.s32 4294967295, %s1433_s14   ;;  %s1522_s15 = sadd.s32 1, %s1433_s14   ;;  %s1433_s14 = sphi %s1506_s14, %s1803_s14   ;;  %s1429_s13 = sphi %s1504_s13, %s1807_s13   ;;  %s1425_s12 = sphi %s1502_s12, %s1806_s12   ;;  %s1421_s11 = sphi %s1500_s11, %s1805_s11  }
   0x8   : > { %1781 = sst [smem:[#allocation17_spill]] %s1522_s15  ;;  %s70_s16 = ssub.s32 %s1433_s14, %s1522_s15 }
   0x9   : > { %s73_s17 = sadd.s32 1, %s1429_s13  ;;  %p71_p0 = scmp.eq.s32.totalorder %s70_s16, 0 }
   0xa   : > { %p80_p1 = scmp.ne.s32.totalorder %s1429_s13, %s1425_s12  ;;  %p81_p2 = scmp.eq.s32.totalorder %s1433_s14, 0 }
   0xb   : > { %p86_p3 = scmp.ne.s32.totalorder %s1425_s12, %s1421_s11  ;;  %p1773_p5 = scmp.eq.s32.totalorder %s1519_s8, 0 }
   0xc   : > { %s1532_s18 = scalar_select %p71_p0, %s1429_s13, %s73_s17  }
   0xd   : > { %p1534_p4 = por %p81_p2, %p80_p1  ;;  %p965_p6 = scmp.ge.s32.totalorder %s1433_s14, 1 }
   0xe   : > { %1782 = sst [smem:[#allocation18_spill]] %s1532_s18  ;;  %p244_p7 = scmp.lt.s32.totalorder %s1433_s14, 9 }
   0xf   : > { %p1543_p8 = por %p1773_p5, %p86_p3  ;;  %s1435_s22 = smov [#allocation4]  }
  0x10   : > { %p1548_p10 = pnand %p965_p6, %p244_p7  ;;  %s257_s23 = sshll.u32 %s1435_s22, 4  ;;  %s258_s23 = int_to_ptr.vmem [resolvable:$true] %s257_s23 }
  0x11   : > { %s1784_s20 = scalar_select %p1543_p8, 1, 0 }
  0x12   : > { %s1785_s21 = scalar_select %p1548_p10, 1, 0 }
  0x13   : > { %p1148_p11 = pneg %p1548_p10  ;;  %p1169_p12 = scmp.lt.s32.totalorder %s1433_s14, 8 }
  0x14   : > { %s1436_s25 = smov [#allocation6]   ;;  %s1788_s0 = sld [smem:[#allocation19_spill]] }
  0x15   : > { %p1557_p13 = pnand %p1148_p11, %p1773_p5  ;;  %s268_s26 = sshll.u32 %s1436_s25, 4  ;;  %s1567_s26 = int_to_ptr.vmem [resolvable:$true] %s268_s26 }
  0x16   : > { %p1563_p0 = pnand %p1169_p12, %p1534_p4 }
  0x17   : > { %p1577_p2 = pneg %p1557_p13 }
  0x18   : > { %s1787_s27 = scalar_select %p1563_p0, 1, 0 }
  0x1a   : > { %s1241_s30 = scalar_lea.hbm %s1788_s0, 64 }
  0x1b   : > { %p1242_p1 = scmp.ne.s32.totalorder %s1788_s0, %s1241_s30  ;;  %p1248_p6 = scmp.lt.u32.totalorder %s1241_s30, %s1788_s0 }
  0x1d   : > { %p1244_p3 = pnand %p1577_p2, %p1242_p1 }
  0x1f   : > { %p1245_p4 = pneg %p1244_p3 }
  0x21   : > { %p1250_p7 = pnand %p1248_p6, %p1245_p4 }
  0x23   : > { %1253 = shalt.err (!%p1250_p7)
}
  0x24   : > { %s1254_s22 = scalar_lea.vmem %s258_s23, 64  ;;  %p1262_p5 = scmp.lt.s32.totalorder %s258_s23, %s258_s23 }
  0x25   : > { %p1255_p11 = scmp.ne.s32.totalorder %s258_s23, %s1254_s22  ;;  %p1263_p8 = scmp.lt.s32.totalorder %s1254_s22, %s1254_s22 }
  0x27   : > { %p1257_p12 = pnand %p1255_p11, %p1577_p2  ;;  %p1264_p10 = por %p1263_p8, %p1262_p5 }
  0x29   : > { %p1258_p9 = pneg %p1257_p12 }
  0x2b   : > { %p1265_p0 = pnand %p1264_p10, %p1258_p9 }
  0x2d   : > { %1268 = shalt.err (!%p1265_p0)
}
  0x2e   : > { %1151 = dma.hbm_to_vmem [thread:$0]  (!%p1557_p13), %s1788_s0, 64, %s258_s23, [#allocation5]  }
  0x2f   : > { %s1437_s29 = smov [#allocation9]   ;;  %s1790_s1 = sld [smem:[#allocation20_spill]] }
  0x30   : > { %s278_s30 = sshll.u32 %s1437_s29, 4  ;;  %s279_s30 = int_to_ptr.vmem [resolvable:$true] %s278_s30 }
  0x35   : > { %s1269_s17 = scalar_lea.hbm %s1790_s1, 128 }
  0x36   : > { %p1270_p1 = scmp.ne.s32.totalorder %s1790_s1, %s1269_s17  ;;  %p1276_p9 = scmp.lt.u32.totalorder %s1269_s17, %s1790_s1 }
  0x38   : > { %p1272_p5 = pnand %p1270_p1, %p1577_p2 }
  0x3a   : > { %p1273_p8 = pneg %p1272_p5 }
  0x3c   : > { %p1278_p10 = pnand %p1276_p9, %p1273_p8 }
  0x3e   : > { %1281 = shalt.err (!%p1278_p10)
}
  0x3f   : > { %s1282_s23 = scalar_lea.vmem %s1567_s26, 128  ;;  %p1290_p6 = scmp.lt.s32.totalorder %s1567_s26, %s1567_s26 }
  0x40   : > { %p1283_p0 = scmp.ne.s32.totalorder %s1567_s26, %s1282_s23  ;;  %p1291_p7 = scmp.lt.s32.totalorder %s1282_s23, %s1282_s23 }
  0x42   : > { %p1285_p3 = pnand %p1283_p0, %p1577_p2  ;;  %p1292_p11 = por %p1291_p7, %p1290_p6 }
  0x44   : > { %p1286_p4 = pneg %p1285_p3 }
  0x46   : > { %p1293_p12 = pnand %p1292_p11, %p1286_p4 }
  0x48   : > { %1296 = shalt.err (!%p1293_p12)
}
  0x49   : > { %1154 = dma.hbm_to_vmem [thread:$0]  (!%p1557_p13), %s1790_s1, 128, %s1567_s26, [#allocation7]  }
  0x4a   : > { %s1297_s29 = scalar_lea.hbm %s1766_s3, 8192 }
  0x4b   : > { %p1298_p1 = scmp.ne.s32.totalorder %s1766_s3, %s1297_s29  ;;  %p1304_p9 = scmp.lt.u32.totalorder %s1297_s29, %s1766_s3 }
  0x4d   : > { %p1300_p5 = pnand %p1298_p1, %p1577_p2 }
  0x4f   : > { %p1301_p8 = pneg %p1300_p5 }
  0x51   : > { %p1306_p10 = pnand %p1304_p9, %p1301_p8 }
  0x53   : > { %1309 = shalt.err (!%p1306_p10)
}
  0x54   : > { %s1310_s22 = scalar_lea.vmem %s279_s30, 8192  ;;  %p1318_p6 = scmp.lt.s32.totalorder %s279_s30, %s279_s30 }
  0x55   : > { %p1311_p0 = scmp.ne.s32.totalorder %s279_s30, %s1310_s22  ;;  %p1319_p7 = scmp.lt.s32.totalorder %s1310_s22, %s1310_s22 }
  0x57   : > { %p1313_p3 = pnand %p1311_p0, %p1577_p2  ;;  %p1320_p11 = por %p1319_p7, %p1318_p6 }
  0x59   : > { %p1314_p4 = pneg %p1313_p3 }
  0x5b   : > { %p1321_p12 = pnand %p1320_p11, %p1314_p4 }
  0x5d   : > { %1324 = shalt.err (!%p1321_p12)
}
  0x5e   : > { %s1438_s26 = smov 256   ;;  %s1439_s23 = smov 16  }
  0x5f   : > { %1157 = dma.hbm_to_vmem [thread:$0]  (!%p1557_p13), %s1766_s3, 8192, %s279_s30, [#allocation7], %s1438_s26, %s1438_s26, %s1439_s23  }
  0x60   : > { %s1440_s25 = smov [#allocation10]   ;;  %s317_s29 = sand.u32 1, %s1433_s14  }
  0x61   : > { %s294_s28 = sshll.u32 %s1440_s25, 4  ;;  %s1325_s17 = scalar_lea.hbm %s1768_s5, 8192  ;;  %s295_s28 = int_to_ptr.vmem [resolvable:$true] %s294_s28 }
  0x62   : > { %p1326_p1 = scmp.ne.s32.totalorder %s1768_s5, %s1325_s17  ;;  %p1332_p9 = scmp.lt.u32.totalorder %s1325_s17, %s1768_s5 }
  0x64   : > { %p1328_p5 = pnand %p1326_p1, %p1577_p2 }
  0x66   : > { %p1329_p8 = pneg %p1328_p5 }
  0x68   : > { %p1334_p10 = pnand %p1332_p9, %p1329_p8 }
  0x6a   : > { %1337 = shalt.err (!%p1334_p10)
}
  0x6b   : > { %s1338_s30 = scalar_lea.vmem %s295_s28, 8192  ;;  %p1346_p6 = scmp.lt.s32.totalorder %s295_s28, %s295_s28 }
  0x6c   : > { %p1339_p0 = scmp.ne.s32.totalorder %s295_s28, %s1338_s30  ;;  %p1347_p7 = scmp.lt.s32.totalorder %s1338_s30, %s1338_s30 }
  0x6e   : > { %p1341_p3 = pnand %p1339_p0, %p1577_p2  ;;  %p1348_p11 = por %p1347_p7, %p1346_p6 }
  0x70   : > { %p1342_p4 = pneg %p1341_p3 }
  0x72   : > { %p1349_p12 = pnand %p1348_p11, %p1342_p4 }
  0x74   : > { %1352 = shalt.err (!%p1349_p12)
}
  0x75   : > { %1160 = dma.hbm_to_vmem [thread:$0]  (!%p1557_p13), %s1768_s5, 8192, %s295_s28, [#allocation11], %s1438_s26, %s1438_s26, %s1439_s23  }
  0x76   : > { %s319_s0 = sand.u32 1, %s1429_s13   ;;  %s1001_s1 = sshll.u32 %s1433_s14, 7 }
  0x77   : > { %s971_s16 = sshll.u32 %s319_s0, 7  ;;  %s1658_s11 = scalar_lea.hbm %s1765_s2, %s1001_s1 }
  0x78   : > { %s321_s24 = scalar_lea.vmem [#allocation8], %s971_s16  ;;  %s1662_s19 = scalar_lea.sflag [#allocation5], %s317_s29 }
  0x79   : > { %s328_s17 = sshll.u32 %s321_s24, 4  ;;  %s1353_s22 = scalar_lea.hbm %s1658_s11, 2048  ;;  %s1660_s17 = int_to_ptr.vmem [resolvable:$true] %s328_s17 }
  0x7a   : > { %p1354_p13 = scmp.ne.s32.totalorder %s1658_s11, %s1353_s22  ;;  %p1791_p2 = scmp.ne.s32.totalorder %s1787_s27, 0 }
  0x7b   : > { %s1358_s23 = scalar_lea.hbm %s1765_s2, 16384  ;;  %p1359_p9 = scmp.lt.u32.totalorder %s1658_s11, %s1765_s2 }
  0x7c   : > { %p1355_p1 = pneg %p1791_p2  ;;  %p1360_p10 = scmp.lt.u32.totalorder %s1358_s23, %s1353_s22 }
  0x7d   : > { %p1362_p3 = scmp.lt.u32.totalorder %s1353_s22, %s1658_s11 }
  0x7e   : > { %p1356_p5 = pnand %p1355_p1, %p1354_p13  ;;  %p1361_p0 = por %p1360_p10, %p1359_p9 }
  0x80   : > { %p1357_p8 = pneg %p1356_p5  ;;  %p1363_p4 = por %p1362_p3, %p1361_p0 }
  0x82   : > { %p1364_p6 = pnand %p1363_p4, %p1357_p8 }
  0x84   : > { %1367 = shalt.err (!%p1364_p6)
}
  0x85   : > { %s1368_s29 = scalar_lea.vmem %s1660_s17, 2048  ;;  %s1441_s15 = smov [#allocation8]  }
  0x86   : > { %p1369_p7 = scmp.ne.s32.totalorder %s1660_s17, %s1368_s29  ;;  %s1373_s18 = sshll.u32 %s1441_s15, 4  ;;  %s1374_s18 = int_to_ptr.vmem [resolvable:$false] %s1373_s18 }
  0x87   : > { %s1375_s0 = scalar_lea.vmem %s1374_s18, 4096  ;;  %p1376_p13 = scmp.lt.s32.totalorder %s1660_s17, %s1374_s18 }
  0x88   : > { %p1371_p11 = pnand %p1369_p7, %p1355_p1  ;;  %p1377_p5 = scmp.lt.s32.totalorder %s1375_s0, %s1368_s29 }
  0x8a   : > { %p1372_p12 = pneg %p1371_p11  ;;  %p1378_p9 = por %p1377_p5, %p1376_p13 }
  0x8c   : > { %p1379_p10 = pnand %p1378_p9, %p1372_p12 }
  0x8e   : > { %1382 = shalt.err (!%p1379_p10)
}
  0x8f   : > { %s1442_s1 = smov 1024   ;;  %s1443_s16 = smov 128  }
  0x90   : > { %s1444_s25 = smov 8   ;;  %p1792_p1 = scmp.ne.s32.totalorder %s1785_s21, 0 }
  0x91   : > { %1164 = dma.hbm_to_vmem [thread:$0]  (!%p1791_p2), %s1658_s11, 2048, %s1660_s17, %s1662_s19, %s1442_s1, %s1443_s16, %s1444_s25  }
  0x92   : > { %340 = sbr.rel (%p1792_p1) target bundleno = 1048 (0x418), region = 56  ;;  %p1793_p8 = scmp.eq.s32.totalorder (!%p1792_p1), %s1519_s8, 0 }
  0x99   : > { %1400 = dma.done.wait (%p1793_p8), [#allocation5], 64   ;;  %p1794_p0 = pmov %p1793_p8 }
  0x9b   : > { %1402 = vsyncadd (%p1794_p0), [#allocation5], 4294967232  ;;  %p1795_p3 = pmov %p1794_p0 }
  0x9c   : > { %p1796_p4 = pmov %p1794_p0 }
  0x9d   : > { %1404 = dma.done.wait (%p1795_p3), [#allocation7], 128  }
  0x9e   : > { %1406 = vsyncadd (%p1796_p4), [#allocation7], 4294967168  ;;  %s350_s27 = sand.u32 1, %s1519_s8   ;;  %s352_s10 = sand.u32 1, %s1425_s12  }
  0x9f   : > { %s977_s11 = sshll.u32 %s352_s10, 7  ;;  %s351_s21 = scalar_lea.sflag [#allocation5], %s350_s27 }
  0xa0   : > { %s1702_s24 = scalar_lea.vmem [#allocation8], %s977_s11  ;;  %p1797_p2 = scmp.ne.s32.totalorder %s1784_s20, 0 }
  0xa2   : > { %1408 = dma.done.wait (%p1797_p2), %s351_s21, 2048  }
  0xa3   : > { %1410 = vsyncadd (%p1797_p2), %s351_s21, 4294965248  ;;  %p1798_p6 = pmov %p1794_p0 }
  0xa4   : > { %p1799_p7 = pmov %p1794_p0 }
  0xa5   : > { %1412 = dma.done.wait (%p1798_p6), [#allocation7], 8192  }
  0xa6   : > { %1414 = vsyncadd (%p1799_p7), [#allocation7], 4294959104  ;;  %p1800_p11 = pmov %p1794_p0 }
  0xa7   : > { %p1801_p12 = pmov %p1794_p0 }
  0xa8   : > { %1416 = dma.done.wait (%p1800_p11), [#allocation11], 8192  }
  0xa9   : > { %1418 = vsyncadd (%p1801_p12), [#allocation11], 4294959104  ;;  %p1802_p13 = scmp.ne.s32.totalorder %s1519_s8, 0 }
  0xaa   : > { %v1445_v1 = vmov (!%p1802_p13), 0.0  }
  0xab   : > { %397 = sbr.rel (%p1802_p13) target bundleno = 178 (0xb2), region = 80  ;;  %398 = vst [vmem:[#allocation2] sm:$0xff] (!%p1802_p13), %v1445_v1  ;;  %399 = vst [vmem:[#allocation2 + $0x8] sm:$0xff] (!%p1802_p13), %v1445_v1 }
  0xb2 PF: > { %v1217_v2 = vld [vmem:[%s1702_s24 + $0x4] ss:$8 sps:$4 sm:$0xff]   ;;  %v1219_v3 = vld [vmem:[%s1702_s24] ss:$8 sps:$4 sm:$0xff]   ;;  %v1446_v4 = vmov 0   ;;  %v401_v5 = vlaneseq  ;;  %v403_v10 = vstv %s1519_s8  ;;  %vm406_vm1 = vcmask 64512  }
  0xb3   : > { %539 = vmatprep.mubr.bf16.mxu0 %v1446_v4  ;;  %507 = vmatprep.subr.bf16.mxu0 %v1217_v2  ;;  %v1220_v6 = vld [vmem:[%s1702_s24 + $0x14] ss:$8 sps:$4 sm:$0xff]   ;;  %v1222_v7 = vld [vmem:[%s1702_s24 + $0x10] ss:$8 sps:$4 sm:$0xff]   ;;  %v1223_v8 = vld [vmem:[%s1702_s24 + $0x24] ss:$8 sps:$4 sm:$0xff]  }
  0xb4   : > { %508 = vmatpush1.bf16.msra.mxu0 %v1219_v3  ;;  %v402_v9 = vand.u32 127, %v401_v5  ;;  %v1225_v11 = vld [vmem:[%s1702_s24 + $0x20] ss:$8 sps:$4 sm:$0xff]   ;;  %v1226_v12 = vld [vmem:[%s1702_s24 + $0x34] ss:$8 sps:$4 sm:$0xff]   ;;  %p997_p5 = scmp.ne.s32.totalorder %s1519_s8, 7 }
  0xb5   : > { %509 = vmatprep.subr.bf16.mxu0 %v1220_v6  ;;  %v1228_v13 = vld [vmem:[%s1702_s24 + $0x30] ss:$8 sps:$4 sm:$0xff]   ;;  %v1229_v15 = vld [vmem:[%s1702_s24 + $0x44] ss:$8 sps:$4 sm:$0xff]   ;;  %v1231_v18 = vld [vmem:[%s1702_s24 + $0x40] ss:$8 sps:$4 sm:$0xff]  }
  0xb6   : > { %vm404_vm0 = vcmp.eq.s32.totalorder %v402_v9, %v403_v10  ;;  %v400_v14 = vld [vmem:[#allocation6] sm:$0xff]  ;;  %v1235_v21 = vld [vmem:[%s1702_s24 + $0x64] ss:$8 sps:$4 sm:$0xff]   ;;  %v1237_v22 = vld [vmem:[%s1702_s24 + $0x60] ss:$8 sps:$4 sm:$0xff]   ;;  %vm885_vm2 = vcmask (!%p997_p5), 7168  }
  0xb7   : > { %v405_v16 = vsel %vm404_vm0, %v400_v14, 0.0  ;;  %v1232_v19 = vld [vmem:[%s1702_s24 + $0x54] ss:$8 sps:$4 sm:$0xff]   ;;  %v1234_v20 = vld [vmem:[%s1702_s24 + $0x50] ss:$8 sps:$4 sm:$0xff]   ;;  %v548_v28 = vld [vmem:[#allocation2] sm:$0xff] }
  0xb8   : > { %510 = vmatpush1.bf16.msra.mxu0 %v1222_v7  ;;  %v407_v17 = vsel %vm406_vm1, %v405_v16, 0.0  ;;  %v1238_v23 = vld [vmem:[%s1702_s24 + $0x74] ss:$8 sps:$4 sm:$0xff]   ;;  %v1240_v24 = vld [vmem:[%s1702_s24 + $0x70] ss:$8 sps:$4 sm:$0xff]   ;;  %v563_v37 = vld [vmem:[#allocation9 + $0x8] sm:$0xff] (!%p997_p5) }
  0xb9   : > { %511 = vmatprep.subr.bf16.mxu0 %v1223_v8  ;;  %408 = vadd.xlane.f32.xlu0 %v407_v17  ;;  %v410_v25 = vld [vmem:[#allocation4] sm:$0xf]  ;;  %v549_v31 = vld [vmem:[#allocation2 + $0x8] sm:$0xff]  ;;  %v565_v38 = vld [vmem:[#allocation9 + $0x18] sm:$0xff] (!%p997_p5) }
  0xba   : > { %v562_v39 = vld [vmem:[#allocation9] sm:$0xff] (!%p997_p5)  ;;  %v1002_v40 = vpack.c.bf16 (!%p997_p5), %v565_v38, %v563_v37  ;;  %v564_v41 = vld [vmem:[#allocation9 + $0x10] sm:$0xff] (!%p997_p5)  ;;  %v567_v42 = vld [vmem:[#allocation9 + $0x28] sm:$0xff] (!%p997_p5) }
  0xbb   : > { %v569_v43 = vld [vmem:[#allocation9 + $0x38] sm:$0xff] (!%p997_p5)  ;;  %v1004_v44 = vpack.c.bf16 (!%p997_p5), %v564_v41, %v562_v39  ;;  %v566_v46 = vld [vmem:[#allocation9 + $0x20] sm:$0xff] (!%p997_p5)  ;;  %v568_v47 = vld [vmem:[#allocation9 + $0x30] sm:$0xff] (!%p997_p5) }
  0xbc   : > { %512 = vmatpush1.bf16.msra.mxu0 %v1225_v11  ;;  %v1006_v45 = vpack.c.bf16 (!%p997_p5), %v569_v43, %v567_v42  ;;  %v571_v48 = vld [vmem:[#allocation9 + $0x48] sm:$0xff] (!%p997_p5)  ;;  %v573_v49 = vld [vmem:[#allocation9 + $0x58] sm:$0xff] (!%p997_p5)  ;;  %v1008_v50 = vpack.c.bf16 (!%p997_p5), %v568_v47, %v566_v46  ;;  %v570_v52 = vld [vmem:[#allocation9 + $0x40] sm:$0xff] (!%p997_p5) }
  0xbd   : > { %513 = vmatprep.subr.bf16.mxu0 %v1226_v12  ;;  %v1010_v51 = vpack.c.bf16 (!%p997_p5), %v573_v49, %v571_v48  ;;  %v572_v53 = vld [vmem:[#allocation9 + $0x50] sm:$0xff] (!%p997_p5)  ;;  %v575_v54 = vld [vmem:[#allocation9 + $0x68] sm:$0xff] (!%p997_p5)  ;;  %v577_v55 = vld [vmem:[#allocation9 + $0x78] sm:$0xff] (!%p997_p5) }
  0xbe   : > { %v1012_v56 = vpack.c.bf16 (!%p997_p5), %v572_v53, %v570_v52  ;;  %v1014_v57 = vpack.c.bf16 (!%p997_p5), %v577_v55, %v575_v54  ;;  %v574_v58 = vld [vmem:[#allocation9 + $0x60] sm:$0xff] (!%p997_p5)  ;;  %v576_v59 = vld [vmem:[#allocation9 + $0x70] sm:$0xff] (!%p997_p5)  ;;  %v579_v60 = vld [vmem:[#allocation9 + $0x88] sm:$0xff] (!%p997_p5) }
  0xbf   : > { %v581_v61 = vld [vmem:[#allocation9 + $0x98] sm:$0xff] (!%p997_p5)  ;;  %v1016_v62 = vpack.c.bf16 (!%p997_p5), %v576_v59, %v574_v58  ;;  %v578_v0 = vld [vmem:[#allocation9 + $0x80] sm:$0xff] (!%p997_p5)  ;;  %v580_v1 = vld [vmem:[#allocation9 + $0x90] sm:$0xff] (!%p997_p5) }
  0xc0   : > { %514 = vmatpush1.bf16.msra.mxu0 %v1228_v13  ;;  %v1018_v63 = vpack.c.bf16 (!%p997_p5), %v581_v61, %v579_v60  ;;  %v583_v2 = vld [vmem:[#allocation9 + $0xa8] sm:$0xff] (!%p997_p5)  ;;  %v585_v3 = vld [vmem:[#allocation9 + $0xb8] sm:$0xff] (!%p997_p5)  ;;  %v1020_v4 = vpack.c.bf16 (!%p997_p5), %v580_v1, %v578_v0  ;;  %v582_v7 = vld [vmem:[#allocation9 + $0xa0] sm:$0xff] (!%p997_p5) }
  0xc1   : > { %515 = vmatprep.subr.bf16.mxu0 %v1229_v15  ;;  %v1022_v6 = vpack.c.bf16 (!%p997_p5), %v585_v3, %v583_v2  ;;  %v584_v8 = vld [vmem:[#allocation9 + $0xb0] sm:$0xff] (!%p997_p5)  ;;  %v587_v9 = vld [vmem:[#allocation9 + $0xc8] sm:$0xff] (!%p997_p5)  ;;  %v589_v10 = vld [vmem:[#allocation9 + $0xd8] sm:$0xff] (!%p997_p5) }
  0xc2   : > { %v1024_v11 = vpack.c.bf16 (!%p997_p5), %v584_v8, %v582_v7  ;;  %v586_v12 = vld [vmem:[#allocation9 + $0xc0] sm:$0xff] (!%p997_p5)  ;;  %v588_v13 = vld [vmem:[#allocation9 + $0xd0] sm:$0xff] (!%p997_p5)  ;;  %v1026_v14 = vpack.c.bf16 (!%p997_p5), %v589_v10, %v587_v9  ;;  %v591_v15 = vld [vmem:[#allocation9 + $0xe8] sm:$0xff] (!%p997_p5) }
  0xc3   : > { %v593_v16 = vld [vmem:[#allocation9 + $0xf8] sm:$0xff] (!%p997_p5)  ;;  %v719_v39 = vld [vmem:[#allocation10 + $0x40] sm:$0xff] (!%p997_p5)  ;;  %v724_v42 = vld [vmem:[#allocation10 + $0x68] sm:$0xff] (!%p997_p5) }
  0xc4   : > { %516 = vmatpush1.bf16.msra.mxu0 %v1231_v18  ;;  %v712_v18 = vld [vmem:[#allocation10 + $0x8] sm:$0xff] (!%p997_p5)  ;;  %v726_v43 = vld [vmem:[#allocation10 + $0x78] sm:$0xff] (!%p997_p5)  ;;  %v596_v46 = vld [vmem:[#allocation9 + $0x110] sm:$0xff] (!%p997_p5) }
  0xc5   : > { %517 = vmatprep.subr.bf16.mxu0 %v1232_v19  ;;  %v714_v19 = vld [vmem:[#allocation10 + $0x18] sm:$0xff] (!%p997_p5)  ;;  %v599_v47 = vld [vmem:[#allocation9 + $0x128] sm:$0xff] (!%p997_p5)  ;;  %v725_v52 = vld [vmem:[#allocation10 + $0x70] sm:$0xff] (!%p997_p5) }
  0xc6   : > { %v601_v48 = vld [vmem:[#allocation9 + $0x138] sm:$0xff] (!%p997_p5)  ;;  %v728_v54 = vld [vmem:[#allocation10 + $0x88] sm:$0xff] (!%p997_p5)  ;;  %v600_v58 = vld [vmem:[#allocation9 + $0x130] sm:$0xff] (!%p997_p5) }
  0xc7   : > { %v730_v55 = vld [vmem:[#allocation10 + $0x98] sm:$0xff] (!%p997_p5)  ;;  %v603_v59 = vld [vmem:[#allocation9 + $0x148] sm:$0xff] (!%p997_p5)  ;;  %v729_v0 = vld [vmem:[#allocation10 + $0x90] sm:$0xff] (!%p997_p5) }
  0xc8   : > { %518 = vmatpush1.bf16.msra.mxu0 %v1234_v20  ;;  %v711_v20 = vld [vmem:[#allocation10] sm:$0xff] (!%p997_p5)  ;;  %v605_v60 = vld [vmem:[#allocation9 + $0x158] sm:$0xff] (!%p997_p5)  ;;  %v732_v2 = vld [vmem:[#allocation10 + $0xa8] sm:$0xff] (!%p997_p5) }
  0xc9   : > { %519 = vmatprep.subr.bf16.mxu0 %v1235_v21  ;;  %v1066_v21 = vpack.c.bf16 (!%p997_p5), %v714_v19, %v712_v18  ;;  %v734_v3 = vld [vmem:[#allocation10 + $0xb8] sm:$0xff] (!%p997_p5)  ;;  %v604_v7 = vld [vmem:[#allocation9 + $0x150] sm:$0xff] (!%p997_p5)  ;;  %v607_v8 = vld [vmem:[#allocation9 + $0x168] sm:$0xff] (!%p997_p5) }
  0xca   : > { %v609_v9 = vld [vmem:[#allocation9 + $0x178] sm:$0xff] (!%p997_p5)  ;;  %v606_v18 = vld [vmem:[#allocation9 + $0x160] sm:$0xff] (!%p997_p5)  ;;  %v608_v19 = vld [vmem:[#allocation9 + $0x170] sm:$0xff] (!%p997_p5) }
  0xcb   : > { %1067 = vmatprep.subr.bf16.mxu1 (!%p997_p5), %v1066_v21  ;;  %v613_v21 = vld [vmem:[#allocation9 + $0x198] sm:$0xff] (!%p997_p5) }
  0xcc   : > { %520 = vmatpush1.bf16.msra.mxu0 %v1237_v22  ;;  %v713_v22 = vld [vmem:[#allocation10 + $0x10] sm:$0xff] (!%p997_p5) }
  0xcd   : > { %521 = vmatprep.subr.bf16.mxu0 %v1238_v23  ;;  %v716_v23 = vld [vmem:[#allocation10 + $0x28] sm:$0xff] (!%p997_p5) }
  0xd0   : > { %522 = vmatpush1.bf16.msra.mxu0 %v1240_v24  ;;  %v718_v24 = vld [vmem:[#allocation10 + $0x38] sm:$0xff] (!%p997_p5) }
  0xd1   : > { %1003 = vmatprep.subr.bf16.mxu0 (!%p997_p5), %v1002_v40  ;;  %v721_v40 = vld [vmem:[#allocation10 + $0x50] sm:$0xff] (!%p997_p5) }
  0xd2   : > { %v1076_v49 = vpack.c.bf16 (!%p997_p5), %v721_v40, %v719_v39  ;;  %v744_v39 = vld [vmem:[#allocation10 + $0x108] sm:$0xff] (!%p997_p5)  ;;  %v746_v40 = vld [vmem:[#allocation10 + $0x118] sm:$0xff] (!%p997_p5) }
  0xd3   : > { %540 = vmatmul.mubr.bf16.vlgmr.msra.gmra.mrb[0].mxu0 %v410_v25  ;;  %v1028_v25 = vpack.c.bf16 (!%p997_p5), %v588_v13, %v586_v12  ;;  %v731_v12 = vld [vmem:[#allocation10 + $0xa0] sm:$0xff] (!%p997_p5)  ;;  %v733_v13 = vld [vmem:[#allocation10 + $0xb0] sm:$0xff] (!%p997_p5) }
  0xd4   : > { %1005 = vmatpush1.bf16.msra.mxu0 (!%p997_p5), %v1004_v44 }
  0xd5   : > { %1007 = vmatprep.subr.bf16.mxu0 (!%p997_p5), %v1006_v45  ;;  %v594_v45 = vld [vmem:[#allocation9 + $0x100] sm:$0xff] (!%p997_p5) }
  0xd6   : > { %v1036_v53 = vpack.c.bf16 (!%p997_p5), %v596_v46, %v594_v45  ;;  %v621_v45 = vld [vmem:[#allocation9 + $0x1d8] sm:$0xff] (!%p997_p5) }
  0xd8   : > { %1009 = vmatpush1.bf16.msra.mxu0 (!%p997_p5), %v1008_v50  ;;  %v1078_v50 = vpack.c.bf16 (!%p997_p5), %v726_v43, %v724_v42  ;;  %v614_v42 = vld [vmem:[#allocation9 + $0x1a0] sm:$0xff] (!%p997_p5)  ;;  %v616_v43 = vld [vmem:[#allocation9 + $0x1b0] sm:$0xff] (!%p997_p5) }
  0xd9   : > { %1011 = vmatprep.subr.bf16.mxu0 (!%p997_p5), %v1010_v51  ;;  %v723_v51 = vld [vmem:[#allocation10 + $0x60] sm:$0xff] (!%p997_p5) }
  0xda   : > { %v1080_v61 = vpack.c.bf16 (!%p997_p5), %v725_v52, %v723_v51  ;;  %v748_v51 = vld [vmem:[#allocation10 + $0x128] sm:$0xff] (!%p997_p5)  ;;  %v750_v52 = vld [vmem:[#allocation10 + $0x138] sm:$0xff] (!%p997_p5) }
  0xdc   : > { %1013 = vmatpush1.bf16.msra.mxu0 (!%p997_p5), %v1012_v56  ;;  %v1038_v56 = vpack.c.bf16 (!%p997_p5), %v601_v48, %v599_v47  ;;  %v1098_v47 = vpack.c.bf16 (!%p997_p5), %v746_v40, %v744_v39  ;;  %v743_v48 = vld [vmem:[#allocation10 + $0x100] sm:$0xff] (!%p997_p5)  ;;  %v773_v40 = vld [vmem:[#allocation10 + $0x1f0] sm:$0xff] (!%p997_p5) }
  0xdd   : > { %1015 = vmatprep.subr.bf16.mxu0 (!%p997_p5), %v1014_v57  ;;  %v598_v57 = vld [vmem:[#allocation9 + $0x120] sm:$0xff] (!%p997_p5) }
  0xde   : > { %v1040_v1 = vpack.c.bf16 (!%p997_p5), %v600_v58, %v598_v57  ;;  %v625_v57 = vld [vmem:[#allocation9 + $0x1f8] sm:$0xff] (!%p997_p5)  ;;  %v771_v39 = vld [vmem:[#allocation10 + $0x1e0] sm:$0xff] (!%p997_p5) }
  0xe0   : > { %1017 = vmatpush1.bf16.msra.mxu0 (!%p997_p5), %v1016_v62  ;;  %v1082_v62 = vpack.c.bf16 (!%p997_p5), %v730_v55, %v728_v54  ;;  %v618_v54 = vld [vmem:[#allocation9 + $0x1c0] sm:$0xff] (!%p997_p5)  ;;  %v620_v55 = vld [vmem:[#allocation9 + $0x1d0] sm:$0xff] (!%p997_p5) }
  0xe1   : > { %1019 = vmatprep.subr.bf16.mxu0 (!%p997_p5), %v1018_v63  ;;  %v727_v63 = vld [vmem:[#allocation10 + $0x80] sm:$0xff] (!%p997_p5) }
  0xe2   : > { %v1084_v10 = vpack.c.bf16 (!%p997_p5), %v729_v0, %v727_v63  ;;  %v752_v63 = vld [vmem:[#allocation10 + $0x148] sm:$0xff] (!%p997_p5)  ;;  %v754_v0 = vld [vmem:[#allocation10 + $0x158] sm:$0xff] (!%p997_p5) }
  0xe4   : > { %1021 = vmatpush1.bf16.msra.mxu0 (!%p997_p5), %v1020_v4  ;;  %v1042_v4 = vpack.c.bf16 (!%p997_p5), %v605_v60, %v603_v59  ;;  %v1102_v59 = vpack.c.bf16 (!%p997_p5), %v750_v52, %v748_v51  ;;  %v747_v60 = vld [vmem:[#allocation10 + $0x120] sm:$0xff] (!%p997_p5) }
  0xe5   : > { %1023 = vmatprep.subr.bf16.mxu0 (!%p997_p5), %v1022_v6  ;;  %v602_v6 = vld [vmem:[#allocation9 + $0x140] sm:$0xff] (!%p997_p5) }
  0xe8   : > { %1025 = vmatpush1.bf16.msra.mxu0 (!%p997_p5), %v1024_v11  ;;  %v1086_v11 = vpack.c.bf16 (!%p997_p5), %v734_v3, %v732_v2  ;;  %v622_v2 = vld [vmem:[#allocation9 + $0x1e0] sm:$0xff] (!%p997_p5)  ;;  %v624_v3 = vld [vmem:[#allocation9 + $0x1f0] sm:$0xff] (!%p997_p5) }
  0xe9   : > { %1027 = vmatprep.subr.bf16.mxu0 (!%p997_p5), %v1026_v14  ;;  %v1044_v14 = vpack.c.bf16 (!%p997_p5), %v604_v7, %v602_v6  ;;  %v1106_v6 = vpack.c.bf16 (!%p997_p5), %v754_v0, %v752_v63  ;;  %v751_v7 = vld [vmem:[#allocation10 + $0x140] sm:$0xff] (!%p997_p5) }
  0xec   : > { %1029 = vmatpush1.bf16.msra.mxu0 (!%p997_p5), %v1028_v25  ;;  %v737_v25 = vld [vmem:[#allocation10 + $0xd0] sm:$0xff] (!%p997_p5) }
 0x146   : > { %v409_v26 = vpop.xlane.xlu0 %408 }
 0x1a6   : > { %v541_v27 = vpop.f32.mrb[0].mxu0  ;;  %559 = sbr.rel (%p997_p5) target bundleno = 1048 (0x418), region = 84 }
 0x1a7   : > { %v550_v29 = vmul.f32 %v541_v27, %v409_v26  ;;  %v543_v30 = vpop.f32.mrb[1].mxu0  ;;  %v1070_v27 = vpack.c.bf16 (!%p997_p5), %v718_v24, %v716_v23  ;;  %v735_v24 = vld [vmem:[#allocation10 + $0xc0] sm:$0xff] (!%p997_p5) }
 0x1a8   : > { %v551_v32 = vmul.f32 %v543_v30, %v409_v26  ;;  %v545_v33 = vpop.f32.mrb[2].mxu0  ;;  %v1068_v26 = vpack.c.bf16 (!%p997_p5), %v713_v22, %v711_v20  ;;  %v720_v30 = vld [vmem:[#allocation10 + $0x48] sm:$0xff] (!%p997_p5)  ;;  %v1088_v22 = vpack.c.bf16 (!%p997_p5), %v733_v13, %v731_v12 }
 0x1a9   : > { %v552_v34 = vadd.f32 %v550_v29, %v548_v28  ;;  %v546_v35 = vpop.f32.mrb[3].mxu0  ;;  %v715_v28 = vld [vmem:[#allocation10 + $0x20] sm:$0xff] (!%p997_p5)  ;;  %v717_v29 = vld [vmem:[#allocation10 + $0x30] sm:$0xff] (!%p997_p5)  ;;  %v611_v20 = vld [vmem:[#allocation9 + $0x188] sm:$0xff] (!%p997_p5) }
 0x1aa   : > { %v553_v36 = vadd.f32 %v551_v32, %v549_v31  ;;  %v1030_v31 = vpack.c.bf16 (!%p997_p5), %v593_v16, %v591_v15  ;;  %v590_v32 = vld [vmem:[#allocation9 + $0xe0] sm:$0xff] (!%p997_p5)  ;;  %v592_v33 = vld [vmem:[#allocation9 + $0xf0] sm:$0xff] (!%p997_p5)  ;;  %v595_v35 = vld [vmem:[#allocation9 + $0x108] sm:$0xff] (!%p997_p5)  ;;  %1069 = vmatpush1.bf16.msra.mxu1 (!%p997_p5), %v1068_v26  ;;  %v1072_v37 = vpack.c.bf16 (!%p997_p5), %v717_v29, %v715_v28  ;;  %v1048_v26 = vpack.c.bf16 (!%p997_p5), %v608_v19, %v606_v18 }
 0x1ab   : > { %554 = vst [vmem:[#allocation2] sm:$0xff] %v552_v34  ;;  %v722_v34 = vld [vmem:[#allocation10 + $0x58] sm:$0xff] (!%p997_p5)  ;;  %1071 = vmatprep.subr.bf16.mxu1 (!%p997_p5), %v1070_v27  ;;  %v1032_v41 = vpack.c.bf16 (!%p997_p5), %v592_v33, %v590_v32  ;;  %v736_v15 = vld [vmem:[#allocation10 + $0xc8] sm:$0xff] (!%p997_p5)  ;;  %v1050_v29 = vpack.c.bf16 (!%p997_p5), %v613_v21, %v611_v20  ;;  %v759_v21 = vld [vmem:[#allocation10 + $0x180] sm:$0xff] (!%p997_p5) }
 0x1ac   : > { %555 = vst [vmem:[#allocation2 + $0x8] sm:$0xff] %v553_v36  ;;  %v597_v36 = vld [vmem:[#allocation9 + $0x118] sm:$0xff] (!%p997_p5)  ;;  %v1074_v38 = vpack.c.bf16 (!%p997_p5), %v722_v34, %v720_v30  ;;  %1031 = vmatprep.subr.bf16.mxu0 (!%p997_p5), %v1030_v31  ;;  %v740_v27 = vld [vmem:[#allocation10 + $0xe8] sm:$0xff] (!%p997_p5)  ;;  %v610_v30 = vld [vmem:[#allocation9 + $0x180] sm:$0xff] (!%p997_p5)  ;;  %v1092_v34 = vpack.c.bf16 (!%p997_p5), %v737_v25, %v735_v24 }
 0x1ad   : > { %v1034_v44 = vpack.c.bf16 %v597_v36, %v595_v35  ;;  %1033 = vmatpush1.bf16.msra.mxu0 %v1032_v41  ;;  %v738_v16 = vld [vmem:[#allocation10 + $0xd8] sm:$0xff]  ;;  %v612_v31 = vld [vmem:[#allocation9 + $0x190] sm:$0xff]  ;;  %v615_v32 = vld [vmem:[#allocation9 + $0x1a8] sm:$0xff] }
 0x1ae   : > { %1073 = vmatpush1.bf16.msra.mxu1 %v1072_v37  ;;  %v1090_v23 = vpack.c.bf16 %v738_v16, %v736_v15  ;;  %v742_v28 = vld [vmem:[#allocation10 + $0xf8] sm:$0xff]  ;;  %v739_v36 = vld [vmem:[#allocation10 + $0xe0] sm:$0xff]  ;;  %v741_v37 = vld [vmem:[#allocation10 + $0xf0] sm:$0xff] }
 0x1af   : > { %1075 = vmatprep.subr.bf16.mxu1 %v1074_v38  ;;  %1035 = vmatprep.subr.bf16.mxu0 %v1034_v44  ;;  %v617_v33 = vld [vmem:[#allocation9 + $0x1b8] sm:$0xff]  ;;  %v1094_v35 = vpack.c.bf16 %v742_v28, %v740_v27  ;;  %v1052_v38 = vpack.c.bf16 %v612_v31, %v610_v30  ;;  %v619_v44 = vld [vmem:[#allocation9 + $0x1c8] sm:$0xff]  ;;  %v1096_v46 = vpack.c.bf16 %v741_v37, %v739_v36  ;;  %v757_v15 = vld [vmem:[#allocation10 + $0x170] sm:$0xff] }
 0x1b0   : > { %v1054_v41 = vpack.c.bf16 %v617_v33, %v615_v32  ;;  %v762_v18 = vld [vmem:[#allocation10 + $0x198] sm:$0xff]  ;;  %v763_v27 = vld [vmem:[#allocation10 + $0x1a0] sm:$0xff]  ;;  %v765_v28 = vld [vmem:[#allocation10 + $0x1b0] sm:$0xff] }
 0x1b1   : > { %1037 = vmatpush1.bf16.msra.mxu0 %v1036_v53  ;;  %v1058_v53 = vpack.c.bf16 %v621_v45, %v619_v44  ;;  %v766_v24 = vld [vmem:[#allocation10 + $0x1b8] sm:$0xff]  ;;  %v1120_v31 = vpack.c.bf16 %v765_v28, %v763_v27  ;;  %v767_v33 = vld [vmem:[#allocation10 + $0x1c0] sm:$0xff]  ;;  %v772_v36 = vld [vmem:[#allocation10 + $0x1e8] sm:$0xff] }
 0x1b2   : > { %1077 = vmatpush1.bf16.msra.mxu1 %v1076_v49  ;;  %1039 = vmatprep.subr.bf16.mxu0 %v1038_v56  ;;  %v745_v49 = vld [vmem:[#allocation10 + $0x110] sm:$0xff]  ;;  %v623_v56 = vld [vmem:[#allocation9 + $0x1e8] sm:$0xff]  ;;  %v770_v30 = vld [vmem:[#allocation10 + $0x1d8] sm:$0xff] }
 0x1b3   : > { %v561_v17 = vld [vmem:[#allocation2 + $0x8] sm:$0xff]  ;;  %1079 = vmatprep.subr.bf16.mxu1 %v1078_v50  ;;  %v1056_v50 = vpack.c.bf16 %v616_v43, %v614_v42  ;;  %v1100_v58 = vpack.c.bf16 %v745_v49, %v743_v48  ;;  %v560_v16 = vld [vmem:[#allocation2] sm:$0xff]  ;;  %v774_v37 = vld [vmem:[#allocation10 + $0x1f8] sm:$0xff]  ;;  %v629_v42 = vshrl.u32 %v401_v5, 7 }
 0x1b4   : > { %702 = vmatprep.mubr.f32.mxu0 %v561_v17  ;;  %v1046_v17 = vpack.c.bf16 %v609_v9, %v607_v8  ;;  %v753_v8 = vld [vmem:[#allocation10 + $0x150] sm:$0xff]  ;;  %v1064_v9 = vpack.c.bf16 %v624_v3, %v622_v2  ;;  %v626_v44 = vld [vmem:[%s1767_s4] sm:$0x3] }
 0x1b5   : > { %1041 = vmatpush1.bf16.msra.mxu0 %v1040_v1  ;;  %v1062_v1 = vpack.c.bf16 %v625_v57, %v623_v56  ;;  %v1108_v12 = vpack.c.bf16 %v753_v8, %v751_v7  ;;  %v630_v43 = vsub.s32 0, %v629_v42  ;;  %v634_v45 = vsub.s32 1, %v629_v42  ;;  %v775_v5 = vld [vmem:[%s1769_s6] sm:$0x3] }
 0x1b6   : > { %1081 = vmatpush1.bf16.msra.mxu1 %v1080_v61  ;;  %1043 = vmatprep.subr.bf16.mxu0 %v1042_v4  ;;  %v749_v61 = vld [vmem:[#allocation10 + $0x130] sm:$0xff]  ;;  %v860_v56 = vld [vmem:[%s1770_s7] sm:$0x3] }
 0x1b7   : > { %1083 = vmatprep.subr.bf16.mxu1 %v1082_v62  ;;  %v1060_v62 = vpack.c.bf16 %v620_v55, %v618_v54  ;;  %v1104_v4 = vpack.c.bf16 %v749_v61, %v747_v60  ;;  %v780_v54 = vrot.slane %v775_v5, %v630_v43  ;;  %v784_v55 = vrot.slane %v775_v5, %v634_v45 }
 0x1b8   : > { %v865_v60 = vrot.slane %v860_v56, %v630_v43 }
 0x1b9   : > { %1045 = vmatpush1.bf16.msra.mxu0 %v1044_v14  ;;  %v755_v14 = vld [vmem:[#allocation10 + $0x160] sm:$0xff] }
 0x1ba   : > { %1085 = vmatpush1.bf16.msra.mxu1 %v1084_v10  ;;  %1047 = vmatprep.subr.bf16.mxu0 %v1046_v17  ;;  %v756_v10 = vld [vmem:[#allocation10 + $0x168] sm:$0xff]  ;;  %v1112_v19 = vpack.c.bf16 %v757_v15, %v755_v14 }
 0x1bb   : > { %1087 = vmatprep.subr.bf16.mxu1 %v1086_v11  ;;  %v758_v11 = vld [vmem:[#allocation10 + $0x178] sm:$0xff]  ;;  %v760_v17 = vld [vmem:[#allocation10 + $0x188] sm:$0xff] }
 0x1bc   : > { %v1110_v13 = vpack.c.bf16 %v758_v11, %v756_v10  ;;  %v1114_v20 = vpack.c.bf16 %v762_v18, %v760_v17 }
 0x1bd   : > { %1049 = vmatpush1.bf16.msra.mxu0 %v1048_v26 }
 0x1be   : > { %1089 = vmatpush1.bf16.msra.mxu1 %v1088_v22  ;;  %1051 = vmatprep.subr.bf16.mxu0 %v1050_v29  ;;  %v761_v22 = vld [vmem:[#allocation10 + $0x190] sm:$0xff]  ;;  %v768_v29 = vld [vmem:[#allocation10 + $0x1c8] sm:$0xff] }
 0x1bf   : > { %1091 = vmatprep.subr.bf16.mxu1 %v1090_v23  ;;  %v764_v23 = vld [vmem:[#allocation10 + $0x1a8] sm:$0xff]  ;;  %v1116_v25 = vpack.c.bf16 %v761_v22, %v759_v21  ;;  %v1122_v32 = vpack.c.bf16 %v770_v30, %v768_v29 }
 0x1c0   : > { %v1118_v26 = vpack.c.bf16 %v766_v24, %v764_v23 }
 0x1c1   : > { %1053 = vmatpush1.bf16.msra.mxu0 %v1052_v38  ;;  %v1126_v38 = vpack.c.bf16 %v774_v37, %v772_v36 }
 0x1c2   : > { %1093 = vmatpush1.bf16.msra.mxu1 %v1092_v34  ;;  %1055 = vmatprep.subr.bf16.mxu0 %v1054_v41  ;;  %v769_v34 = vld [vmem:[#allocation10 + $0x1d0] sm:$0xff]  ;;  %v1128_v41 = vpack.c.bf16 %v773_v40, %v771_v39 }
 0x1c3   : > { %1095 = vmatprep.subr.bf16.mxu1 %v1094_v35  ;;  %v1124_v35 = vpack.c.bf16 %v769_v34, %v767_v33 }
 0x1c5   : > { %1057 = vmatpush1.bf16.msra.mxu0 %v1056_v50 }
 0x1c6   : > { %1097 = vmatpush1.bf16.msra.mxu1 %v1096_v46  ;;  %1059 = vmatprep.subr.bf16.mxu0 %v1058_v53  ;;  %v631_v46 = vrot.slane %v626_v44, %v630_v43 }
 0x1c7   : > { %1099 = vmatprep.subr.bf16.mxu1 %v1098_v47  ;;  %v635_v47 = vrot.slane %v626_v44, %v634_v45 }
 0x1c9   : > { %1061 = vmatpush1.bf16.msra.mxu0 %v1060_v62  ;;  %v869_v62 = vrot.slane %v860_v56, %v634_v45 }
 0x1ca   : > { %1101 = vmatpush1.bf16.msra.mxu1 %v1100_v58  ;;  %1063 = vmatprep.subr.bf16.mxu0 %v1062_v1 }
 0x1cb   : > { %1103 = vmatprep.subr.bf16.mxu1 %v1102_v59 }
 0x1cd   : > { %1065 = vmatpush1.bf16.msra.mxu0 %v1064_v9 }
 0x1ce   : > { %1105 = vmatpush1.bf16.msra.mxu1 %v1104_v4  ;;  %v998_v4 = vld [vmem:[#allocation3] ss:$0 sm:$0xff] }
 0x1cf   : > { %1107 = vmatprep.subr.bf16.mxu1 %v1106_v6 }
 0x1d0   : > { %703 = vmatmul.mubr.f32.vlgmr.msra.gmra.mrb[0].mxu0 %v560_v16 }
 0x1d2   : > { %1109 = vmatpush1.bf16.msra.mxu1 %v1108_v12 }
 0x1d3   : > { %1111 = vmatprep.subr.bf16.mxu1 %v1110_v13 }
 0x1d6   : > { %1113 = vmatpush1.bf16.msra.mxu1 %v1112_v19 }
 0x1d7   : > { %1115 = vmatprep.subr.bf16.mxu1 %v1114_v20 }
 0x1da   : > { %1117 = vmatpush1.bf16.msra.mxu1 %v1116_v25 }
 0x1db   : > { %1119 = vmatprep.subr.bf16.mxu1 %v1118_v26 }
 0x1de   : > { %1121 = vmatpush1.bf16.msra.mxu1 %v1120_v31 }
 0x1df   : > { %1123 = vmatprep.subr.bf16.mxu1 %v1122_v32 }
 0x1e2   : > { %1125 = vmatpush1.bf16.msra.mxu1 %v1124_v35 }
 0x1e3   : > { %1127 = vmatprep.subr.bf16.mxu1 %v1126_v38 }
 0x1e6   : > { %1129 = vmatpush1.bf16.msra.mxu1 %v1128_v41 }
 0x2a3   : > { %v704_v48 = vpop.f32.mrb[0].mxu0 }
 0x2a4   : > { %v705_v49 = vadd.f32 %v704_v48, %v631_v46  ;;  %v706_v50 = vpop.f32.mrb[1].mxu0 }
 0x2a5   : > { %v707_v51 = vadd.f32 %v706_v50, %v635_v47 }
 0x2a6   : > { %v709_v53 = vmax.f32 %v705_v49, 0.0 }
 0x2a7   : > { %v710_v52 = vmax.f32 %v707_v51, 0.0 }
 0x2a9   : > { %851 = vmatprep.mubr.f32.mxu1 %v710_v52 }
 0x2aa   : > { %852 = vmatmul.mubr.f32.vlgmr.msra.gmra.mrb[0].mxu1 %v709_v53 }
 0x37d   : > { %v853_v57 = vpop.f32.mrb[0].mxu1 }
 0x37e   : > { %v854_v58 = vadd.f32 %v853_v57, %v780_v54  ;;  %v855_v59 = vpop.f32.mrb[1].mxu1 }
 0x37f   : > { %v856_v61 = vadd.f32 %v855_v59, %v784_v55 }
 0x380   : > { %v858_v63 = vmax.f32 %v854_v58, 0.0 }
 0x381   : > { %v859_v0 = vmax.f32 %v856_v61, 0.0 }
 0x382   : > { %v872_v1 = vmul.f32 %v865_v60, %v858_v63 }
 0x383   : > { %v873_v2 = vmul.f32 %v869_v62, %v859_v0 }
 0x385   : > { %v874_v3 = vadd.f32 %v873_v2, %v872_v1 }
 0x387   : > { %875 = vadd.xlane.f32.xlu0 %v874_v3 }
 0x414   : > { %v876_v6 = vpop.xlane.xlu0 %875 }
 0x415   : > { %v884_v7 = vadd.f32 %v998_v4, %v876_v6 }
 0x417   : > { %886 = vst.msk [vmem:[%s1772_s9] sm:$0xff] %vm885_vm2, %v884_v7 }
 0x418 PF: > { %s1803_s14 = sld [smem:[#allocation17_spill]]  ;;  %s1804_s28 = sld [smem:[#allocation18_spill]] }
 0x419   : > { %s1805_s11 = smov %s1425_s12  ;;  %s1806_s12 = smov %s1429_s13 }
 0x41e   : > { %p21_p9 = scmp.ge.s32.totalorder %s1803_s14, 10   ;;  %s1807_s13 = smov %s1804_s28 }
 0x420   :  { %23 = sbr.rel (!%p21_p9) target bundleno = 7 (0x7), region = 115 }
 0x427   :  { %898 = vsyncpa [#allocation5], 1 }
 0x428   :  { %900 = vsyncpa [#allocation5 + $0x1], 1 }
 0x429   :  { %901 = vsyncpa [#allocation7], 1 }
 0x42a   :  { %902 = vsyncpa [#allocation11], 1 }

</bundles_post_ra>
